<compile_context>
chip_gen: v7x
topology: tpu7x:2x2x1
jax: 0.10.0
libtpu: 0.0.40
codegen_flags: <defaults>
</compile_context>

<pallas_src>
import math
import jax
import jax.numpy as jnp
from jax.experimental import pallas as pl
from jax.experimental.pallas import tpu as pltpu

BN_EPS = 1e-5


# ----------------------------------------------------------------------------
# Kernel
# ----------------------------------------------------------------------------
def _decoder_kernel(x_ref, vec_ref, w_ref, scal_ref, out_ref):
    """Fused single-block forward.

    x_ref   : (N, 128)   f32  raw node features (option column folded at pack time)
    vec_ref : (8, 128)   f32  packed per-feature vectors:
              row 0 gamma0[:128], row 1 beta0[:128], row 2 bias0_eff (64, zero-padded),
              row 3 gamma1 (64),  row 4 beta1 (64),  row 5 bias1 (128),
              row 6 gamma2 (128), row 7 beta2 (128)
    w_ref   : (320, 128) f32  packed weights:
              rows   0:128  W0[:128, :64]   (lanes 64:128 zero)
              rows 128:192  W1 (64, 128)
              rows 192:320  W2 (128, 1) in lane 0 (lanes 1:128 zero)
    scal_ref: (2,)  f32  SMEM  [bias2, null_q]
    out_ref : (N+1, 128) f32  lane-padded output; column 0 holds the result,
              row N holds sigmoid(null_q).
    """
    n = x_ref.shape[0]
    inv_n = 1.0 / n

    def bn_scale_shift(y, gamma, beta):
        # Training-mode BN (biased batch variance), one-pass stats, expressed as
        # an affine (scale, shift):   BN(y) = y * scale + shift
        mean = jnp.sum(y, axis=0, keepdims=True) * inv_n
        var = jnp.sum(y * y, axis=0, keepdims=True) * inv_n - mean * mean
        var = jnp.maximum(var, 0.0)                       # guard tiny cancellation
        scale = gamma * jax.lax.rsqrt(var + BN_EPS)
        shift = beta - mean * scale
        return scale, shift

    x = x_ref[...]                                        # (N, 128)

    # ---- layer 0: BN(129; option column folded) -> Linear(129->64) -> ReLU ----
    s0, t0 = bn_scale_shift(x, vec_ref[0:1, :], vec_ref[1:2, :])
    w0 = w_ref[0:128, 0:64]                               # (128, 64)
    h = jnp.dot(x * s0, w0, preferred_element_type=jnp.float32)
    h = h + jnp.dot(t0, w0, preferred_element_type=jnp.float32) + vec_ref[2:3, 0:64]
    h = jnp.maximum(h, 0.0)                               # (N, 64)

    # ---- layer 1: BN(64) -> NoisyLinear(64->128) -> ReLU ----------------------
    s1, t1 = bn_scale_shift(h, vec_ref[3:4, 0:64], vec_ref[4:5, 0:64])
    w1 = w_ref[128:192, :]                                # (64, 128)
    h = jnp.dot(h * s1, w1, preferred_element_type=jnp.float32)
    h = h + jnp.dot(t1, w1, preferred_element_type=jnp.float32) + vec_ref[5:6, :]
    h = jnp.maximum(h, 0.0)                               # (N, 128)

    # ---- layer 2: BN(128) -> NoisyLinear(128->1), lane-padded to 128 ----------
    s2, t2 = bn_scale_shift(h, vec_ref[6:7, :], vec_ref[7:8, :])
    w2 = w_ref[192:320, :]                                # (128, 128); col 0 is real
    q = jnp.dot(h * s2, w2, preferred_element_type=jnp.float32)
    q = q + jnp.dot(t2, w2, preferred_element_type=jnp.float32) + scal_ref[0]

    # cat([q, null_q], dim=0) then sigmoid; lane-dense stores, column 0 is used.
    out_ref[:n, :] = jax.nn.sigmoid(q)
    out_ref[n:, :] = jax.nn.sigmoid(jnp.zeros((1, 128), jnp.float32) + scal_ref[1])


# ----------------------------------------------------------------------------
# Wrapper + parameter packing
# ----------------------------------------------------------------------------
def pack_params(params):
    """Repack PyTorch-layout params into 3 kernel operands (done once, host-side)."""
    (g0, b0, w0, bi0, g1, b1, w1, bi1, g2, b2, w2, bi2, null_q) = params
    d0 = w0.shape[0]            # 129
    d1 = w0.shape[1]            # 64
    d2 = w1.shape[1]            # 128
    assert d0 - 1 == 128 and d1 <= 128 and d2 == 128 and w2.shape == (d2, 1)

    # Constant `option` column under training-mode BN -> exactly beta0[-1];
    # fold its layer-0 contribution into the layer-0 bias.
    bi0_eff = bi0 + b0[:, d0 - 1:] * w0[d0 - 1:, :]       # (1, d1)

    def row(v):
        v = v.reshape(1, -1).astype(jnp.float32)
        return jnp.pad(v, ((0, 0), (0, 128 - v.shape[1])))

    vec = jnp.concatenate([
        row(g0[:, :128]), row(b0[:, :128]), row(bi0_eff),
        row(g1), row(b1), row(bi1),
        row(g2), row(b2),
    ], axis=0)                                            # (8, 128)

    w_slab = jnp.concatenate([
        jnp.pad(w0[:128, :], ((0, 0), (0, 128 - d1))),    # (128, 128)
        w1,                                               # (64, 128)
        jnp.pad(w2, ((0, 0), (0, 127))),                  # (128, 128)
    ], axis=0).astype(jnp.float32)                        # (320, 128)

    scal = jnp.concatenate([bi2.reshape(-1), null_q.reshape(-1)]).astype(jnp.float32)
    return vec, w_slab, scal


def decoder_forward(x, option, packed):
    """x: (N, 128) f32, option: (1,) f32 (kept for API parity; under training-mode
    BN the constant option column cancels — only beta0[128] survives, already
    folded into the packed bias)."""
    del option
    vec, w_slab, scal = packed
    n = x.shape[0]
    out = pl.pallas_call(
        _decoder_kernel,
        out_shape=jax.ShapeDtypeStruct((n + 1, 128), jnp.float32),
        in_specs=[
            pl.BlockSpec(memory_space=pltpu.MemorySpace.VMEM),   # x
            pl.BlockSpec(memory_space=pltpu.MemorySpace.VMEM),   # packed vectors
            pl.BlockSpec(memory_space=pltpu.MemorySpace.VMEM),   # packed weights
            pl.BlockSpec(memory_space=pltpu.MemorySpace.SMEM),   # [bias2, null_q]
        ],
        out_specs=pl.BlockSpec(memory_space=pltpu.MemorySpace.VMEM),
    )(x, vec, w_slab, scal)
    return out[:, 0]                                      # (N+1,)


# ----------------------------------------------------------------------------
# Deterministic parameter construction (mirrors the PyTorch __init__).
# ----------------------------------------------------------------------------
def _scale_noise(key, size):
    x = jax.random.normal(key, (size,), dtype=jnp.float32)
    return jnp.sign(x) * jnp.sqrt(jnp.abs(x))


def make_params(key, node_feature_size=128, linear_layers_size=(64, 128)):
    d0 = node_feature_size + 1
    d1, d2 = linear_layers_size
    ks = jax.random.split(key, 12)

    # plain Linear(d0 -> d1): PyTorch default uniform(-1/sqrt(in), 1/sqrt(in))
    r0 = 1.0 / math.sqrt(d0)
    w0 = jax.random.uniform(ks[0], (d0, d1), jnp.float32, -r0, r0)       # (in, out)
    bi0 = jax.random.uniform(ks[1], (1, d1), jnp.float32, -r0, r0)

    def noisy_linear(k_w, k_b, k_ein, k_eout, fan_in, fan_out, std_init=0.5):
        mu_range = 1.0 / math.sqrt(fan_in)
        w_mu = jax.random.uniform(k_w, (fan_out, fan_in), jnp.float32, -mu_range, mu_range)
        w_sigma = jnp.full((fan_out, fan_in), std_init / math.sqrt(fan_in), jnp.float32)
        b_mu = jax.random.uniform(k_b, (fan_out,), jnp.float32, -mu_range, mu_range)
        b_sigma = jnp.full((fan_out,), std_init / math.sqrt(fan_out), jnp.float32)
        eps_in = _scale_noise(k_ein, fan_in)
        eps_out = _scale_noise(k_eout, fan_out)
        w_eff = (w_mu + w_sigma * jnp.outer(eps_out, eps_in)).T            # (in, out)
        b_eff = (b_mu + b_sigma * eps_out).reshape(1, fan_out)
        return w_eff, b_eff

    w1, bi1 = noisy_linear(ks[2], ks[3], ks[4], ks[5], d1, d2)
    w2, bi2 = noisy_linear(ks[6], ks[7], ks[8], ks[9], d2, 1)

    # BatchNorm1d defaults: gamma=1, beta=0
    g0, b0 = jnp.ones((1, d0), jnp.float32), jnp.zeros((1, d0), jnp.float32)
    g1, b1 = jnp.ones((1, d1), jnp.float32), jnp.zeros((1, d1), jnp.float32)
    g2, b2 = jnp.ones((1, d2), jnp.float32), jnp.zeros((1, d2), jnp.float32)

    null_q = jax.random.uniform(ks[10], (1, 1), jnp.float32, 0.0, 1.0)

    return (g0, b0, w0, bi0, g1, b1, w1, bi1, g2, b2, w2, bi2, null_q)


# Pure-JAX reference, faithful to the PyTorch forward (including the concat of
# the option column and the explicit BN normalize).
def reference_forward(x, option, params):
    (g0, b0, w0, bi0, g1, b1, w1, bi1, g2, b2, w2, bi2, nq) = params
    n = x.shape[0]
    opt = jnp.broadcast_to(option.reshape(1, 1), (n, 1))
    y = jnp.concatenate([x, opt], axis=1)

    def bn(y, g, b):
        m = jnp.mean(y, axis=0, keepdims=True)
        v = jnp.mean((y - m) ** 2, axis=0, keepdims=True)
        return (y - m) / jnp.sqrt(v + BN_EPS) * g + b

    y = jnp.maximum(bn(y, g0, b0) @ w0 + bi0, 0.0)
    y = jnp.maximum(bn(y, g1, b1) @ w1 + bi1, 0.0)
    y = bn(y, g2, b2) @ w2 + bi2
    y = jnp.concatenate([y, nq], axis=0)
    return jax.nn.sigmoid(y).reshape(-1)


if __name__ == "__main__":
    key = jax.random.PRNGKey(0)
    k_x, k_opt, k_par = jax.random.split(key, 3)

    N = 8
    NODE_FEATURE_SIZE = 128
    x = jax.random.normal(k_x, (N, NODE_FEATURE_SIZE), jnp.float32)
    option = jax.random.normal(k_opt, (1,), jnp.float32)

    params = make_params(k_par, NODE_FEATURE_SIZE, (64, 128))
    packed = pack_params(params)

    fwd = jax.jit(decoder_forward)
    out = jax.block_until_ready(fwd(x, option, packed))

    ref = reference_forward(x, option, params)
    assert out.shape == (N + 1,)
    # Tolerance slightly above f32 noise: the option-column fold replaces the
    # reference's (0/eps)-scaled constant column with its exact limit (beta),
    # and BN stats are computed in fused one-pass form.
    assert jnp.allclose(out, ref, atol=5e-5, rtol=5e-5), (out, ref)

    print("KERNEL_OK")
</pallas_src>

<mosaic_0001>
module attributes {stable_mosaic.version = 11 : i64} {
  func.func @_decoder_kernel(%arg0: memref<8x128xf32, #tpu.memory_space<vmem>>, %arg1: memref<8x128xf32, #tpu.memory_space<vmem>>, %arg2: memref<320x128xf32, #tpu.memory_space<vmem>>, %arg3: memref<2xf32, #tpu.memory_space<smem>>, %arg4: memref<9x128xf32, #tpu.memory_space<vmem>>) attributes {dimension_semantics = [], scalar_prefetch = 0 : i64, scratch_operands = 0 : i64, tpu.core_type = #tpu.core_type<tc>} {
    %c0 = arith.constant 0 : index
    %c0_0 = arith.constant 0 : index
    %0 = vector.load %arg0[%c0, %c0_0] : memref<8x128xf32, #tpu.memory_space<vmem>>, vector<8x128xf32>
    %c0_1 = arith.constant 0 : index
    %c0_2 = arith.constant 0 : index
    %1 = vector.load %arg1[%c0_1, %c0_2] : memref<8x128xf32, #tpu.memory_space<vmem>>, vector<1x128xf32>
    %c1 = arith.constant 1 : index
    %c0_3 = arith.constant 0 : index
    %2 = vector.load %arg1[%c1, %c0_3] : memref<8x128xf32, #tpu.memory_space<vmem>>, vector<1x128xf32>
    %cst = arith.constant dense<0.000000e+00> : vector<128xf32>
    %3 = vector.multi_reduction <add>, %0, %cst [0] : vector<8x128xf32> to vector<128xf32>
    %4 = vector.shape_cast %3 : vector<128xf32> to vector<1x128xf32>
    %cst_4 = arith.constant 1.250000e-01 : f32
    %5 = vector.broadcast %cst_4 : f32 to vector<1x128xf32>
    %6 = arith.mulf %4, %5 : vector<1x128xf32>
    %7 = arith.mulf %0, %0 : vector<8x128xf32>
    %cst_5 = arith.constant dense<0.000000e+00> : vector<128xf32>
    %8 = vector.multi_reduction <add>, %7, %cst_5 [0] : vector<8x128xf32> to vector<128xf32>
    %9 = vector.shape_cast %8 : vector<128xf32> to vector<1x128xf32>
    %cst_6 = arith.constant 1.250000e-01 : f32
    %10 = vector.broadcast %cst_6 : f32 to vector<1x128xf32>
    %11 = arith.mulf %9, %10 : vector<1x128xf32>
    %12 = arith.mulf %6, %6 : vector<1x128xf32>
    %13 = arith.subf %11, %12 : vector<1x128xf32>
    %cst_7 = arith.constant 0.000000e+00 : f32
    %14 = vector.broadcast %cst_7 : f32 to vector<1x128xf32>
    %15 = arith.maximumf %13, %14 : vector<1x128xf32>
    %cst_8 = arith.constant 9.99999974E-6 : f32
    %16 = vector.broadcast %cst_8 : f32 to vector<1x128xf32>
    %17 = arith.addf %15, %16 : vector<1x128xf32>
    %18 = math.rsqrt %17 : vector<1x128xf32>
    %19 = arith.mulf %1, %18 : vector<1x128xf32>
    %20 = arith.mulf %6, %19 : vector<1x128xf32>
    %21 = arith.subf %2, %20 : vector<1x128xf32>
    %c0_9 = arith.constant 0 : index
    %c0_10 = arith.constant 0 : index
    %22 = vector.load %arg2[%c0_9, %c0_10] : memref<320x128xf32, #tpu.memory_space<vmem>>, vector<128x64xf32>
    %23 = vector.broadcast %19 : vector<1x128xf32> to vector<8x128xf32>
    %24 = arith.mulf %0, %23 : vector<8x128xf32>
    %cst_11 = arith.constant dense<0.000000e+00> : vector<8x64xf32>
    %25 = tpu.matmul %24, %22, %cst_11 {dimension_numbers = #tpu.dot_dimension_numbers<[1], [0], [0], [1], [0, 0, 1, 1], [], []>} : vector<8x128xf32>, vector<128x64xf32>, vector<8x64xf32> -> vector<8x64xf32>
    %cst_12 = arith.constant dense<0.000000e+00> : vector<1x64xf32>
    %26 = tpu.matmul %21, %22, %cst_12 {dimension_numbers = #tpu.dot_dimension_numbers<[1], [0], [0], [1], [0, 0, 1, 1], [], []>} : vector<1x128xf32>, vector<128x64xf32>, vector<1x64xf32> -> vector<1x64xf32>
    %27 = vector.broadcast %26 : vector<1x64xf32> to vector<8x64xf32>
    %28 = arith.addf %25, %27 : vector<8x64xf32>
    %c2 = arith.constant 2 : index
    %c0_13 = arith.constant 0 : index
    %29 = vector.load %arg1[%c2, %c0_13] : memref<8x128xf32, #tpu.memory_space<vmem>>, vector<1x64xf32>
    %30 = vector.broadcast %29 : vector<1x64xf32> to vector<8x64xf32>
    %31 = arith.addf %28, %30 : vector<8x64xf32>
    %cst_14 = arith.constant 0.000000e+00 : f32
    %32 = vector.broadcast %cst_14 : f32 to vector<8x64xf32>
    %33 = arith.maximumf %31, %32 : vector<8x64xf32>
    %c3 = arith.constant 3 : index
    %c0_15 = arith.constant 0 : index
    %34 = vector.load %arg1[%c3, %c0_15] : memref<8x128xf32, #tpu.memory_space<vmem>>, vector<1x64xf32>
    %c4 = arith.constant 4 : index
    %c0_16 = arith.constant 0 : index
    %35 = vector.load %arg1[%c4, %c0_16] : memref<8x128xf32, #tpu.memory_space<vmem>>, vector<1x64xf32>
    %cst_17 = arith.constant dense<0.000000e+00> : vector<64xf32>
    %36 = vector.multi_reduction <add>, %33, %cst_17 [0] : vector<8x64xf32> to vector<64xf32>
    %37 = vector.shape_cast %36 : vector<64xf32> to vector<1x64xf32>
    %cst_18 = arith.constant 1.250000e-01 : f32
    %38 = vector.broadcast %cst_18 : f32 to vector<1x64xf32>
    %39 = arith.mulf %37, %38 : vector<1x64xf32>
    %40 = arith.mulf %33, %33 : vector<8x64xf32>
    %cst_19 = arith.constant dense<0.000000e+00> : vector<64xf32>
    %41 = vector.multi_reduction <add>, %40, %cst_19 [0] : vector<8x64xf32> to vector<64xf32>
    %42 = vector.shape_cast %41 : vector<64xf32> to vector<1x64xf32>
    %cst_20 = arith.constant 1.250000e-01 : f32
    %43 = vector.broadcast %cst_20 : f32 to vector<1x64xf32>
    %44 = arith.mulf %42, %43 : vector<1x64xf32>
    %45 = arith.mulf %39, %39 : vector<1x64xf32>
    %46 = arith.subf %44, %45 : vector<1x64xf32>
    %cst_21 = arith.constant 0.000000e+00 : f32
    %47 = vector.broadcast %cst_21 : f32 to vector<1x64xf32>
    %48 = arith.maximumf %46, %47 : vector<1x64xf32>
    %cst_22 = arith.constant 9.99999974E-6 : f32
    %49 = vector.broadcast %cst_22 : f32 to vector<1x64xf32>
    %50 = arith.addf %48, %49 : vector<1x64xf32>
    %51 = math.rsqrt %50 : vector<1x64xf32>
    %52 = arith.mulf %34, %51 : vector<1x64xf32>
    %53 = arith.mulf %39, %52 : vector<1x64xf32>
    %54 = arith.subf %35, %53 : vector<1x64xf32>
    %c128 = arith.constant 128 : index
    %c0_23 = arith.constant 0 : index
    %55 = vector.load %arg2[%c128, %c0_23] : memref<320x128xf32, #tpu.memory_space<vmem>>, vector<64x128xf32>
    %56 = vector.broadcast %52 : vector<1x64xf32> to vector<8x64xf32>
    %57 = arith.mulf %33, %56 : vector<8x64xf32>
    %cst_24 = arith.constant dense<0.000000e+00> : vector<8x128xf32>
    %58 = tpu.matmul %57, %55, %cst_24 {dimension_numbers = #tpu.dot_dimension_numbers<[1], [0], [0], [1], [0, 0, 1, 1], [], []>} : vector<8x64xf32>, vector<64x128xf32>, vector<8x128xf32> -> vector<8x128xf32>
    %cst_25 = arith.constant dense<0.000000e+00> : vector<1x128xf32>
    %59 = tpu.matmul %54, %55, %cst_25 {dimension_numbers = #tpu.dot_dimension_numbers<[1], [0], [0], [1], [0, 0, 1, 1], [], []>} : vector<1x64xf32>, vector<64x128xf32>, vector<1x128xf32> -> vector<1x128xf32>
    %60 = vector.broadcast %59 : vector<1x128xf32> to vector<8x128xf32>
    %61 = arith.addf %58, %60 : vector<8x128xf32>
    %c5 = arith.constant 5 : index
    %c0_26 = arith.constant 0 : index
    %62 = vector.load %arg1[%c5, %c0_26] : memref<8x128xf32, #tpu.memory_space<vmem>>, vector<1x128xf32>
    %63 = vector.broadcast %62 : vector<1x128xf32> to vector<8x128xf32>
    %64 = arith.addf %61, %63 : vector<8x128xf32>
    %cst_27 = arith.constant 0.000000e+00 : f32
    %65 = vector.broadcast %cst_27 : f32 to vector<8x128xf32>
    %66 = arith.maximumf %64, %65 : vector<8x128xf32>
    %c6 = arith.constant 6 : index
    %c0_28 = arith.constant 0 : index
    %67 = vector.load %arg1[%c6, %c0_28] : memref<8x128xf32, #tpu.memory_space<vmem>>, vector<1x128xf32>
    %c7 = arith.constant 7 : index
    %c0_29 = arith.constant 0 : index
    %68 = vector.load %arg1[%c7, %c0_29] : memref<8x128xf32, #tpu.memory_space<vmem>>, vector<1x128xf32>
    %cst_30 = arith.constant dense<0.000000e+00> : vector<128xf32>
    %69 = vector.multi_reduction <add>, %66, %cst_30 [0] : vector<8x128xf32> to vector<128xf32>
    %70 = vector.shape_cast %69 : vector<128xf32> to vector<1x128xf32>
    %cst_31 = arith.constant 1.250000e-01 : f32
    %71 = vector.broadcast %cst_31 : f32 to vector<1x128xf32>
    %72 = arith.mulf %70, %71 : vector<1x128xf32>
    %73 = arith.mulf %66, %66 : vector<8x128xf32>
    %cst_32 = arith.constant dense<0.000000e+00> : vector<128xf32>
    %74 = vector.multi_reduction <add>, %73, %cst_32 [0] : vector<8x128xf32> to vector<128xf32>
    %75 = vector.shape_cast %74 : vector<128xf32> to vector<1x128xf32>
    %cst_33 = arith.constant 1.250000e-01 : f32
    %76 = vector.broadcast %cst_33 : f32 to vector<1x128xf32>
    %77 = arith.mulf %75, %76 : vector<1x128xf32>
    %78 = arith.mulf %72, %72 : vector<1x128xf32>
    %79 = arith.subf %77, %78 : vector<1x128xf32>
    %cst_34 = arith.constant 0.000000e+00 : f32
    %80 = vector.broadcast %cst_34 : f32 to vector<1x128xf32>
    %81 = arith.maximumf %79, %80 : vector<1x128xf32>
    %cst_35 = arith.constant 9.99999974E-6 : f32
    %82 = vector.broadcast %cst_35 : f32 to vector<1x128xf32>
    %83 = arith.addf %81, %82 : vector<1x128xf32>
    %84 = math.rsqrt %83 : vector<1x128xf32>
    %85 = arith.mulf %67, %84 : vector<1x128xf32>
    %86 = arith.mulf %72, %85 : vector<1x128xf32>
    %87 = arith.subf %68, %86 : vector<1x128xf32>
    %c192 = arith.constant 192 : index
    %c0_36 = arith.constant 0 : index
    %88 = vector.load %arg2[%c192, %c0_36] : memref<320x128xf32, #tpu.memory_space<vmem>>, vector<128x128xf32>
    %89 = vector.broadcast %85 : vector<1x128xf32> to vector<8x128xf32>
    %90 = arith.mulf %66, %89 : vector<8x128xf32>
    %cst_37 = arith.constant dense<0.000000e+00> : vector<8x128xf32>
    %91 = tpu.matmul %90, %88, %cst_37 {dimension_numbers = #tpu.dot_dimension_numbers<[1], [0], [0], [1], [0, 0, 1, 1], [], []>} : vector<8x128xf32>, vector<128x128xf32>, vector<8x128xf32> -> vector<8x128xf32>
    %cst_38 = arith.constant dense<0.000000e+00> : vector<1x128xf32>
    %92 = tpu.matmul %87, %88, %cst_38 {dimension_numbers = #tpu.dot_dimension_numbers<[1], [0], [0], [1], [0, 0, 1, 1], [], []>} : vector<1x128xf32>, vector<128x128xf32>, vector<1x128xf32> -> vector<1x128xf32>
    %93 = vector.broadcast %92 : vector<1x128xf32> to vector<8x128xf32>
    %94 = arith.addf %91, %93 : vector<8x128xf32>
    %c0_39 = arith.constant 0 : index
    %95 = memref.load %arg3[%c0_39] : memref<2xf32, #tpu.memory_space<smem>>
    %96 = vector.broadcast %95 : f32 to vector<8x128xf32>
    %97 = arith.addf %94, %96 : vector<8x128xf32>
    %98 = arith.negf %97 : vector<8x128xf32>
    %99 = math.exp %98 : vector<8x128xf32>
    %cst_40 = arith.constant 1.000000e+00 : f32
    %100 = vector.broadcast %cst_40 : f32 to vector<8x128xf32>
    %101 = arith.addf %100, %99 : vector<8x128xf32>
    %102 = arith.divf %100, %101 : vector<8x128xf32>
    %c0_41 = arith.constant 0 : index
    %c0_42 = arith.constant 0 : index
    %103 = vector.load %arg4[%c0_41, %c0_42] : memref<9x128xf32, #tpu.memory_space<vmem>>, vector<8x128xf32>
    tpu.vector_store %arg4[%c0_41, %c0_42], %102 {strides = array<i32>} : memref<9x128xf32, #tpu.memory_space<vmem>>, vector<8x128xf32>,
    %cst_43 = arith.constant 0.000000e+00 : f32
    %104 = vector.broadcast %cst_43 : f32 to vector<1x128xf32>
    %c1_44 = arith.constant 1 : index
    %105 = memref.load %arg3[%c1_44] : memref<2xf32, #tpu.memory_space<smem>>
    %106 = vector.broadcast %105 : f32 to vector<1x128xf32>
    %107 = arith.addf %104, %106 : vector<1x128xf32>
    %108 = arith.negf %107 : vector<1x128xf32>
    %109 = math.exp %108 : vector<1x128xf32>
    %cst_45 = arith.constant 1.000000e+00 : f32
    %110 = vector.broadcast %cst_45 : f32 to vector<1x128xf32>
    %111 = arith.addf %110, %109 : vector<1x128xf32>
    %112 = arith.divf %110, %111 : vector<1x128xf32>
    %c8 = arith.constant 8 : index
    %c0_46 = arith.constant 0 : index
    %113 = vector.load %arg4[%c8, %c0_46] : memref<9x128xf32, #tpu.memory_space<vmem>>, vector<1x128xf32>
    tpu.vector_store %arg4[%c8, %c0_46], %112 {strides = array<i32>} : memref<9x128xf32, #tpu.memory_space<vmem>>, vector<1x128xf32>,
    return
  }
}

</mosaic_0001>

<bundles_post_ra>
// kernel: decoder_forward.1
= control target key start
LH: loop header
LB: loop body
LE: loop exit
PB: predicated region body
PF: predicated region fallthrough
CT: control target
= control target key end

     0   :  { %9 = vsyncpa [#allocation3], 0  ;;  %s1328_s0 = inlined_call_operand.hbm [shape: f32[8,128], index: 0, kind: input, shape index: {}]   ;;  %s1329_s1 = inlined_call_operand.hbm [shape: f32[8,128], index: 1, kind: input, shape index: {}]   ;;  %s1330_s2 = inlined_call_operand.hbm [shape: f32[320,128], index: 2, kind: input, shape index: {}]   ;;  %s1331_s3 = inlined_call_operand.vmem [shape: f32[2], index: 3, kind: input, shape index: {}]   ;;  %s1332_s4 = inlined_call_operand.vmem [shape: f32[9,128], index: 4, kind: output, shape index: {}]  }
   0x1   :  { %10 = vsyncpa [#allocation6], 0 }
   0x2   :  { %11 = vsyncpa [#allocation4], 0  ;;  %s1178_s15 = smov [#allocation5]   ;;  %s1179_s17 = smov [#allocation2]  }
   0x3   :  { %s28_s16 = sshll.u32 %s1178_s15, 4  ;;  %s18_s18 = sshll.u32 %s1179_s17, 4  ;;  %s29_s16 = int_to_ptr.vmem [resolvable:$true] %s28_s16  ;;  %s19_s18 = int_to_ptr.vmem [resolvable:$true] %s18_s18 }
   0x4   :  { %s1094_s21 = scalar_lea.hbm %s1329_s1, 128 }
   0x5   :  { %p1095_p0 = scmp.ne.s32.totalorder %s1329_s1, %s1094_s21  ;;  %p1098_p1 = scmp.lt.u32.totalorder %s1094_s21, %s1329_s1 }
   0x7   :  { %p1100_p2 = pnand %p1098_p1, %p1095_p0 }
   0x9   :  { %1103 = shalt.err (!%p1100_p2)
}
   0xa   :  { %s1104_s26 = scalar_lea.vmem %s29_s16, 128  ;;  %p1109_p4 = scmp.lt.s32.totalorder %s29_s16, %s29_s16 }
   0xb   :  { %p1105_p3 = scmp.ne.s32.totalorder %s29_s16, %s1104_s26  ;;  %p1110_p5 = scmp.lt.s32.totalorder %s1104_s26, %s1104_s26 }
   0xd   :  { %p1111_p6 = por %p1110_p5, %p1109_p4 }
   0xf   :  { %p1112_p7 = pnand %p1111_p6, %p1105_p3 }
  0x11   :  { %1115 = shalt.err (!%p1112_p7)
}
  0x12   :  { %31 = dma.hbm_to_vmem [thread:$0]  %s1329_s1, 128, %s29_s16, [#allocation6]  }
  0x13   :  { %s1116_s5 = scalar_lea.hbm %s1328_s0, 128 }
  0x14   :  { %p1117_p8 = scmp.ne.s32.totalorder %s1328_s0, %s1116_s5  ;;  %p1120_p9 = scmp.lt.u32.totalorder %s1116_s5, %s1328_s0 }
  0x16   :  { %p1122_p10 = pnand %p1120_p9, %p1117_p8 }
  0x18   :  { %1125 = shalt.err (!%p1122_p10)
}
  0x19   :  { %s1126_s10 = scalar_lea.vmem %s19_s18, 128  ;;  %p1131_p12 = scmp.lt.s32.totalorder %s19_s18, %s19_s18 }
  0x1a   :  { %p1127_p11 = scmp.ne.s32.totalorder %s19_s18, %s1126_s10  ;;  %p1132_p13 = scmp.lt.s32.totalorder %s1126_s10, %s1126_s10 }
  0x1c   :  { %p1133_p0 = por %p1132_p13, %p1131_p12 }
  0x1e   :  { %p1134_p1 = pnand %p1133_p0, %p1127_p11 }
  0x20   :  { %1137 = shalt.err (!%p1134_p1)
}
  0x21   :  { %21 = dma.hbm_to_vmem [thread:$0]  %s1328_s0, 128, %s19_s18, [#allocation3]  }
  0x22   :  { %s1180_s12 = smov [#allocation7]   ;;  %s50_s16 = sshll.u32 %s1331_s3, 4  ;;  %s51_s16 = int_to_ptr.vmem [resolvable:$true] %s50_s16 }
  0x23   :  { %s37_s13 = sshll.u32 %s1180_s12, 4  ;;  %s1138_s20 = scalar_lea.hbm %s1330_s2, 5120  ;;  %s38_s13 = int_to_ptr.vmem [resolvable:$true] %s37_s13 }
  0x24   :  { %p1139_p2 = scmp.ne.s32.totalorder %s1330_s2, %s1138_s20  ;;  %p1142_p3 = scmp.lt.u32.totalorder %s1138_s20, %s1330_s2 }
  0x26   :  { %p1144_p4 = pnand %p1142_p3, %p1139_p2 }
  0x28   :  { %1147 = shalt.err (!%p1144_p4)
}
  0x29   :  { %s1148_s0 = scalar_lea.vmem %s38_s13, 5120  ;;  %p1153_p6 = scmp.lt.s32.totalorder %s38_s13, %s38_s13 }
  0x2a   :  { %p1149_p5 = scmp.ne.s32.totalorder %s38_s13, %s1148_s0  ;;  %p1154_p7 = scmp.lt.s32.totalorder %s1148_s0, %s1148_s0 }
  0x2c   :  { %p1155_p8 = por %p1154_p7, %p1153_p6 }
  0x2e   :  { %p1156_p9 = pnand %p1155_p8, %p1149_p5 }
  0x30   :  { %1159 = shalt.err (!%p1156_p9)
}
  0x31   :  { %s1181_s3 = smov 128   ;;  %s1182_s18 = smov 8  }
  0x32   :  { %43 = dma.hbm_to_vmem [thread:$0]  %s1330_s2, 5120, %s38_s13, [#allocation6], %s1181_s3, %s1181_s3, %s1182_s18  }
  0x33   :  { %s1160_s27 = scalar_lea.vmem %s51_s16, 16  ;;  %p1165_p11 = scmp.lt.s32.totalorder %s51_s16, %s51_s16 }
  0x34   :  { %p1161_p10 = scmp.ne.s32.totalorder %s51_s16, %s1160_s27  ;;  %p1166_p12 = scmp.lt.s32.totalorder %s1160_s27, %s1160_s27 }
  0x36   :  { %p1167_p13 = por %p1166_p12, %p1165_p11 }
  0x38   :  { %p1168_p0 = pnand %p1167_p13, %p1161_p10 }
  0x3a   :  { %1171 = shalt.err (!%p1168_p0)
}
  0x3b   :  { %s1183_s28 = smov [#allocation8]  }
  0x3c   :  { %53 = dma.vmem_to_smem %s51_s16, 16, %s1183_s28, [#allocation4]  }
  0x3d   :  { %1172 = dma.done.wait [#allocation3], 128  }
  0x3e   :  { %1173 = vsyncadd [#allocation3], 4294967168 }
  0x3f   :  { %1174 = dma.done.wait [#allocation6], 5248  }
  0x40   :  { %1175 = vsyncadd [#allocation6], 4294962048 }
  0x41   :  { %1176 = dma.done.wait [#allocation4], 16  }
  0x42   :  { %1177 = vsyncadd [#allocation4], 4294967280 }
  0x43   :  { %66 = sfence }
  0x44   :  { %v93_v0 = vld [vmem:[#allocation7] sm:$0xff]  ;;  %v94_v1 = vld [vmem:[#allocation7 + $0x8] sm:$0xff]  ;;  %v95_v2 = vld [vmem:[#allocation7 + $0x10] sm:$0xff]  ;;  %v1184_v3 = vmov 0.0|0.0   ;;  %vm1185_vm0 = vmmov 0   ;;  %v1186_v6 = vmov 0.0   ;;  %v109_v46 = vlaneseq }
  0x45   :  { %951 = vmatprep.subr.bf16.mxu0 %v1184_v3  ;;  %v952_v4 = vpack.c.bf16 %v94_v1, %v93_v0  ;;  %975 = vmatprep.subr.bf16.mxu1 %v1184_v3  ;;  %v96_v5 = vld [vmem:[#allocation7 + $0x18] sm:$0xff]  ;;  %v97_v8 = vld [vmem:[#allocation7 + $0x20] sm:$0xff]  ;;  %v98_v9 = vld [vmem:[#allocation7 + $0x28] sm:$0xff]  ;;  %vm267_vm1 = vcmask 523264   ;;  %s685_s2 = sld [smem:[#allocation8 + $0x1]]  ;;  %s653_s5 = sld [smem:[#allocation8]] }
  0x46   :  { %805 = vmatprep.mubr.msk.f32.mxu0 %vm1185_vm0, %v1186_v6  ;;  %840 = vmatprep.mubr.msk.f32.mxu1 %vm1185_vm0, %v1186_v6  ;;  %v955_v7 = vpack.c.bf16 %v96_v5, %v95_v2  ;;  %v1259_v10 = vld [vmem:[#allocation2] sm:$0xff]  ;;  %v958_v13 = vpack.c.bf16 %v98_v9, %v97_v8  ;;  %v100_v15 = vld [vmem:[#allocation7 + $0x38] sm:$0xff]  ;;  %v101_v21 = vld [vmem:[#allocation7 + $0x40] sm:$0xff]  ;;  %v110_v47 = vshrl.u32 %v109_v46, 7 }
  0x47   :  { %953 = vmatpush3.bf16.msra.mxu0 %v952_v4  ;;  %977 = vmatpush3.bf16.msra.mxu1 %v952_v4  ;;  %v70_v11 = vrot.slane %v1259_v10, 4  ;;  %v77_v12 = vmul.f32 %v1259_v10, %v1259_v10  ;;  %v99_v14 = vld [vmem:[#allocation7 + $0x30] sm:$0xff]  ;;  %v102_v22 = vld [vmem:[#allocation7 + $0x48] sm:$0xff]  ;;  %v104_v29 = vld [vmem:[#allocation7 + $0x58] sm:$0xff] }
  0x48   :  { %954 = vmatprep.subr.bf16.mxu0 %v1184_v3  ;;  %978 = vmatprep.subr.bf16.mxu1 %v1184_v3  ;;  %v961_v20 = vpack.c.bf16 %v100_v15, %v99_v14  ;;  %v964_v27 = vpack.c.bf16 %v102_v22, %v101_v21  ;;  %v103_v28 = vld [vmem:[#allocation7 + $0x50] sm:$0xff]  ;;  %v105_v35 = vld [vmem:[#allocation7 + $0x60] sm:$0xff]  ;;  %v106_v36 = vld [vmem:[#allocation7 + $0x68] sm:$0xff]  ;;  %v1279_v49 = vsub.s32 0, %v110_v47 }
  0x49   :  { %v71_v16 = vadd.f32 %v70_v11, %v1259_v10  ;;  %v78_v17 = vrot.slane %v77_v12, 4  ;;  %v967_v34 = vpack.c.bf16 %v104_v29, %v103_v28  ;;  %v970_v40 = vpack.c.bf16 %v106_v36, %v105_v35  ;;  %v107_v41 = vld [vmem:[#allocation7 + $0x70] sm:$0xff]  ;;  %v108_v42 = vld [vmem:[#allocation7 + $0x78] sm:$0xff]  ;;  %v293_v57 = vld [vmem:[#allocation7 + $0x80] sm:$0xff] }
  0x4a   :  { %v973_v45 = vpack.c.bf16 %v108_v42, %v107_v41  ;;  %v68_v48 = vld [vmem:[#allocation5] sm:$0x1]  ;;  %v69_v52 = vld [vmem:[#allocation5 + $0x1] sm:$0x1]  ;;  %v294_v58 = vld [vmem:[#allocation7 + $0x88] sm:$0xff] }
  0x4b   :  { %956 = vmatpush3.bf16.msra.mxu0 %v955_v7  ;;  %980 = vmatpush3.bf16.msra.mxu1 %v955_v7  ;;  %v72_v18 = vrot.slane %v71_v16, 2  ;;  %v79_v19 = vadd.f32 %v78_v17, %v77_v12  ;;  %v295_v59 = vld [vmem:[#allocation7 + $0x90] sm:$0xff]  ;;  %v1000_v60 = vpack.c.bf16 %v294_v58, %v293_v57  ;;  %v296_v61 = vld [vmem:[#allocation7 + $0x98] sm:$0xff]  ;;  %v297_v63 = vld [vmem:[#allocation7 + $0xa0] sm:$0xff] }
  0x4c   :  { %957 = vmatprep.subr.bf16.mxu0 %v1184_v3  ;;  %981 = vmatprep.subr.bf16.mxu1 %v1184_v3  ;;  %v1003_v62 = vpack.c.bf16 %v296_v61, %v295_v59  ;;  %v298_v0 = vld [vmem:[#allocation7 + $0xa8] sm:$0xff]  ;;  %v299_v2 = vld [vmem:[#allocation7 + $0xb0] sm:$0xff]  ;;  %v300_v4 = vld [vmem:[#allocation7 + $0xb8] sm:$0xff] }
  0x4d   :  { %v73_v23 = vadd.f32 %v72_v18, %v71_v16  ;;  %v80_v24 = vrot.slane %v79_v19, 2  ;;  %v1006_v1 = vpack.c.bf16 %v298_v0, %v297_v63  ;;  %v1009_v5 = vpack.c.bf16 %v300_v4, %v299_v2  ;;  %v680_v12 = vld [vmem:[#allocation5 + $0x2] ss:$0 sm:$0xff]  ;;  %v489_v46 = vld [vmem:[#allocation7 + $0xc8] sm:$0xff]  ;;  %v496_v57 = vld [vmem:[#allocation7 + $0x100] sm:$0xff] }
  0x4e   :  { %v497_v58 = vld [vmem:[#allocation7 + $0x108] sm:$0xff]  ;;  %v499_v61 = vld [vmem:[#allocation7 + $0x118] sm:$0xff]  ;;  %v500_v63 = vld [vmem:[#allocation7 + $0x120] sm:$0xff] }
  0x4f   :  { %959 = vmatpush3.bf16.msra.mxu0 %v958_v13  ;;  %983 = vmatpush3.bf16.msra.mxu1 %v958_v13  ;;  %v74_v25 = vrot.slane %v73_v23, 1  ;;  %v81_v26 = vadd.f32 %v80_v24, %v79_v19  ;;  %v1036_v59 = vpack.c.bf16 %v497_v58, %v496_v57  ;;  %v501_v0 = vld [vmem:[#allocation7 + $0x128] sm:$0xff]  ;;  %v502_v2 = vld [vmem:[#allocation7 + $0x130] sm:$0xff]  ;;  %v503_v4 = vld [vmem:[#allocation7 + $0x138] sm:$0xff] }
  0x50   :  { %960 = vmatprep.subr.bf16.mxu0 %v1184_v3  ;;  %984 = vmatprep.subr.bf16.mxu1 %v1184_v3 }
  0x51   :  { %v75_v30 = vadd.f32 %v74_v25, %v73_v23  ;;  %v82_v31 = vrot.slane %v81_v26, 1 }
  0x53   :  { %962 = vmatpush3.bf16.msra.mxu0 %v961_v20  ;;  %986 = vmatpush3.bf16.msra.mxu1 %v961_v20  ;;  %v76_v32 = vmul.f32 0.125, %v75_v30  ;;  %v83_v33 = vadd.f32 %v82_v31, %v81_v26 }
  0x54   :  { %963 = vmatprep.subr.bf16.mxu0 %v1184_v3  ;;  %987 = vmatprep.subr.bf16.mxu1 %v1184_v3 }
  0x55   :  { %v84_v37 = vmul.f32 0.125, %v83_v33  ;;  %v85_v38 = vmul.f32 %v76_v32, %v76_v32 }
  0x57   :  { %965 = vmatpush3.bf16.msra.mxu0 %v964_v27  ;;  %989 = vmatpush3.bf16.msra.mxu1 %v964_v27  ;;  %v86_v39 = vsub.f32 %v84_v37, %v85_v38  ;;  %v265_v37 = vld [vmem:[#allocation5 + $0x3] sm:$0x1] }
  0x58   :  { %966 = vmatprep.subr.bf16.mxu0 %v1184_v3  ;;  %990 = vmatprep.subr.bf16.mxu1 %v1184_v3 }
  0x59   :  { %v87_v43 = vmax.f32 %v86_v39, 0.0 }
  0x5b   :  { %968 = vmatpush3.bf16.msra.mxu0 %v967_v34  ;;  %992 = vmatpush3.bf16.msra.mxu1 %v967_v34  ;;  %v88_v44 = vadd.f32 1e-05, %v87_v43 }
  0x5c   :  { %969 = vmatprep.subr.bf16.mxu0 %v1184_v3  ;;  %993 = vmatprep.subr.bf16.mxu1 %v1184_v3 }
  0x5d   :  { %1080 = vrsqrt.f32 %v88_v44 }
  0x5f   :  { %971 = vmatpush3.bf16.msra.mxu0 %v970_v40  ;;  %995 = vmatpush3.bf16.msra.mxu1 %v970_v40  ;;  %v266_v40 = vld [vmem:[#allocation5 + $0x4] sm:$0x1] }
  0x60   :  { %972 = vmatprep.subr.bf16.mxu0 %v1184_v3  ;;  %996 = vmatprep.subr.bf16.mxu1 %v1184_v3 }
  0x63   :  { %974 = vmatpush3.bf16.msra.mxu0 %v973_v45  ;;  %998 = vmatpush3.bf16.msra.mxu1 %v973_v45  ;;  %v488_v45 = vld [vmem:[#allocation7 + $0xc0] sm:$0xff] }
  0x64   :  { %999 = vmatprep.subr.bf16.mxu0 %v1184_v3  ;;  %1011 = vmatprep.subr.bf16.mxu1 %v1184_v3  ;;  %v1024_v47 = vpack.c.bf16 %v489_v46, %v488_v45 }
  0x67   :  { %v1081_v50 = vpop.eup %1080 }
  0x68   :  { %v90_v51 = vmul.f32 %v1081_v50, %v68_v48  ;;  %v490_v48 = vld [vmem:[#allocation7 + $0xd0] sm:$0xff]  ;;  %v491_v50 = vld [vmem:[#allocation7 + $0xd8] sm:$0xff] }
  0x6a   :  { %v91_v53 = vmul.f32 %v90_v51, %v76_v32  ;;  %v112_v54 = vrot.slane %v90_v51, %v1279_v49  ;;  %v1027_v51 = vpack.c.bf16 %v491_v50, %v490_v48 }
  0x6c   :  { %v92_v55 = vsub.f32 %v69_v52, %v91_v53  ;;  %v113_v56 = vmul.f32 %v112_v54, %v1259_v10  ;;  %v492_v52 = vld [vmem:[#allocation7 + $0xe0] sm:$0xff]  ;;  %v493_v53 = vld [vmem:[#allocation7 + $0xe8] sm:$0xff]  ;;  %v494_v54 = vld [vmem:[#allocation7 + $0xf0] sm:$0xff] }
  0x6e   :  { %806 = vmatmul.mubr.f32.vlgmr.msra.gmra.mrb[0].mxu0 %v92_v55  ;;  %841 = vmatmul.mubr.f32.vlgmr.msra.gmra.mrb[0].mxu1 %v113_v56  ;;  %v495_v55 = vld [vmem:[#allocation7 + $0xf8] sm:$0xff] }
  0x6f   :  { %859 = vmatprep.mubr.msk.f32.mxu0 %vm1185_vm0, %v1186_v6  ;;  %878 = vmatprep.mubr.msk.f32.mxu1 %vm1185_vm0, %v1186_v6  ;;  %v1033_v56 = vpack.c.bf16 %v495_v55, %v494_v54 }
  0x70   :  { %1001 = vmatpush3.bf16.msra.mxu0 %v1000_v60  ;;  %1013 = vmatpush3.bf16.msra.mxu1 %v1000_v60  ;;  %v498_v60 = vld [vmem:[#allocation7 + $0x110] sm:$0xff] }
  0x71   :  { %1002 = vmatprep.subr.bf16.mxu0 %v1184_v3  ;;  %1014 = vmatprep.subr.bf16.mxu1 %v1184_v3 }
  0x74   :  { %1004 = vmatpush3.bf16.msra.mxu0 %v1003_v62  ;;  %1016 = vmatpush3.bf16.msra.mxu1 %v1003_v62  ;;  %v1039_v62 = vpack.c.bf16 %v499_v61, %v498_v60 }
  0x75   :  { %1005 = vmatprep.subr.bf16.mxu0 %v1184_v3  ;;  %1017 = vmatprep.subr.bf16.mxu1 %v1184_v3 }
  0x78   :  { %1007 = vmatpush3.bf16.msra.mxu0 %v1006_v1  ;;  %1019 = vmatpush3.bf16.msra.mxu1 %v1006_v1  ;;  %v1042_v1 = vpack.c.bf16 %v501_v0, %v500_v63 }
  0x79   :  { %1008 = vmatprep.subr.bf16.mxu0 %v1184_v3  ;;  %1020 = vmatprep.subr.bf16.mxu1 %v1184_v3 }
  0x7c   :  { %1010 = vmatpush3.bf16.msra.mxu0 %v1009_v5  ;;  %1022 = vmatpush3.bf16.msra.mxu1 %v1009_v5  ;;  %v1045_v5 = vpack.c.bf16 %v503_v4, %v502_v2 }
  0x7d   :  { %1023 = vmatprep.subr.bf16.mxu0 %v1184_v3  ;;  %1047 = vmatprep.subr.bf16.mxu1 %v1184_v3 }
 0x141   :  { %v180_v7 = vpop.f32.mrb[0].mxu0  ;;  %v254_v8 = vpop.f32.mrb[0].mxu1 }
 0x142   :  { %v187_v9 = vrot.slane %v180_v7, %v1279_v49  ;;  %v807_v10 = vpop.f32.mrb[1].mxu0  ;;  %v842_v11 = vpop.f32.mrb[1].mxu1 }
 0x144   :  { %v255_v13 = vadd.f32 %v254_v8, %v187_v9 }
 0x146   :  { %v263_v14 = vadd.f32 %v680_v12, %v255_v13  ;;  %v683_v12 = vld [vmem:[#allocation5 + $0x5] ss:$0 sm:$0xff] }
 0x148   :  { %v264_v15 = vmax.f32 %v263_v14, 0.0 }
 0x14a   :  { %v276_v16 = vmul.f32 %v264_v15, %v264_v15  ;;  %v268_v17 = vsel %vm267_vm1, %v264_v15, 0.0 }
 0x14b   :  { %v269_v18 = vrot.slane %v268_v17, 4 }
 0x14c   :  { %v277_v19 = vsel %vm267_vm1, %v276_v16, 0.0 }
 0x14d   :  { %v270_v20 = vadd.f32 %v269_v18, %v268_v17  ;;  %v278_v21 = vrot.slane %v277_v19, 4 }
 0x14f   :  { %v271_v22 = vrot.slane %v270_v20, 2  ;;  %v279_v23 = vadd.f32 %v278_v21, %v277_v19 }
 0x151   :  { %v272_v24 = vadd.f32 %v271_v22, %v270_v20  ;;  %v280_v25 = vrot.slane %v279_v23, 2 }
 0x153   :  { %v273_v26 = vrot.slane %v272_v24, 1  ;;  %v281_v27 = vadd.f32 %v280_v25, %v279_v23 }
 0x155   :  { %v274_v28 = vadd.f32 %v273_v26, %v272_v24  ;;  %v282_v29 = vrot.slane %v281_v27, 1 }
 0x157   :  { %v275_v30 = vmul.f32 0.125, %v274_v28  ;;  %v283_v31 = vadd.f32 %v282_v29, %v281_v27 }
 0x159   :  { %v284_v32 = vmul.f32 0.125, %v283_v31  ;;  %v285_v33 = vmul.f32 %v275_v30, %v275_v30 }
 0x15b   :  { %v286_v34 = vsub.f32 %v284_v32, %v285_v33 }
 0x15d   :  { %v287_v35 = vmax.f32 %v286_v34, 0.0  ;;  %v463_v34 = vld [vmem:[#allocation5 + $0x6] sm:$0x1] }
 0x15f   :  { %v288_v36 = vadd.f32 1e-05, %v287_v35 }
 0x161   :  { %1082 = vrsqrt.f32 %v288_v36 }
 0x16b   :  { %v1083_v38 = vpop.eup %1082 }
 0x16c   :  { %v290_v39 = vmul.f32 %v1083_v38, %v265_v37  ;;  %v464_v37 = vld [vmem:[#allocation5 + $0x7] sm:$0x1] }
 0x16e   :  { %v291_v41 = vmul.f32 %v290_v39, %v275_v30  ;;  %v304_v42 = vrot.slane %v290_v39, %v1279_v49 }
 0x170   :  { %v292_v43 = vsub.f32 %v266_v40, %v291_v41  ;;  %v305_v44 = vmul.f32 %v304_v42, %v264_v15  ;;  %v664_v42 = vstv %s685_s2 }
 0x172   :  { %860 = vmatmul.mubr.msk.f32.vlgmr.msra.gmra.mrb[2].mxu0 %vm267_vm1, %v292_v43  ;;  %879 = vmatmul.mubr.msk.f32.vlgmr.msra.gmra.mrb[2].mxu1 %vm267_vm1, %v305_v44  ;;  %v686_v43 = vmul.f32 -1.442695, %v664_v42 }
 0x173   :  { %913 = vmatprep.mubr.msk.f32.mxu0 %vm1185_vm0, %v1186_v6  ;;  %948 = vmatprep.mubr.msk.f32.mxu1 %vm1185_vm0, %v1186_v6  ;;  %v1030_v6 = vpack.c.bf16 %v493_v53, %v492_v52  ;;  %v654_v53 = vstv %s653_s5 }
 0x174   :  { %1025 = vmatpush3.bf16.msra.mxu0 %v1024_v47  ;;  %1049 = vmatpush3.bf16.msra.mxu1 %v1024_v47 }
 0x175   :  { %1026 = vmatprep.subr.bf16.mxu0 %v1184_v3  ;;  %1050 = vmatprep.subr.bf16.mxu1 %v1184_v3 }
 0x178   :  { %1028 = vmatpush3.bf16.msra.mxu0 %v1027_v51  ;;  %1052 = vmatpush3.bf16.msra.mxu1 %v1027_v51 }
 0x179   :  { %1029 = vmatprep.subr.bf16.mxu0 %v1184_v3  ;;  %1053 = vmatprep.subr.bf16.mxu1 %v1184_v3 }
 0x17c   :  { %1031 = vmatpush3.bf16.msra.mxu0 %v1030_v6  ;;  %1055 = vmatpush3.bf16.msra.mxu1 %v1030_v6 }
 0x17d   :  { %1032 = vmatprep.subr.bf16.mxu0 %v1184_v3  ;;  %1056 = vmatprep.subr.bf16.mxu1 %v1184_v3 }
 0x180   :  { %1034 = vmatpush3.bf16.msra.mxu0 %v1033_v56  ;;  %1058 = vmatpush3.bf16.msra.mxu1 %v1033_v56 }
 0x181   :  { %1035 = vmatprep.subr.bf16.mxu0 %v1184_v3  ;;  %1059 = vmatprep.subr.bf16.mxu1 %v1184_v3 }
 0x184   :  { %1037 = vmatpush3.bf16.msra.mxu0 %v1036_v59  ;;  %1061 = vmatpush3.bf16.msra.mxu1 %v1036_v59 }
 0x185   :  { %1038 = vmatprep.subr.bf16.mxu0 %v1184_v3  ;;  %1062 = vmatprep.subr.bf16.mxu1 %v1184_v3 }
 0x188   :  { %1040 = vmatpush3.bf16.msra.mxu0 %v1039_v62  ;;  %1064 = vmatpush3.bf16.msra.mxu1 %v1039_v62 }
 0x189   :  { %1041 = vmatprep.subr.bf16.mxu0 %v1184_v3  ;;  %1065 = vmatprep.subr.bf16.mxu1 %v1184_v3 }
 0x18c   :  { %1043 = vmatpush3.bf16.msra.mxu0 %v1042_v1  ;;  %1067 = vmatpush3.bf16.msra.mxu1 %v1042_v1 }
 0x18d   :  { %1044 = vmatprep.subr.bf16.mxu0 %v1184_v3  ;;  %1068 = vmatprep.subr.bf16.mxu1 %v1184_v3 }
 0x190   :  { %1046 = vmatpush3.bf16.msra.mxu0 %v1045_v5  ;;  %1070 = vmatpush3.bf16.msra.mxu1 %v1045_v5 }
 0x245   :  { %v375_v7 = vpop.f32.mrb[2].mxu0  ;;  %v452_v8 = vpop.f32.mrb[2].mxu1 }
 0x246   :  { %v382_v9 = vrot.slane %v375_v7, %v1279_v49  ;;  %v861_v10 = vpop.f32.mrb[3].mxu0  ;;  %v880_v11 = vpop.f32.mrb[3].mxu1 }
 0x248   :  { %v453_v13 = vadd.f32 %v452_v8, %v382_v9 }
 0x24a   :  { %v461_v14 = vadd.f32 %v683_v12, %v453_v13 }
 0x24c   :  { %v462_v15 = vmax.f32 %v461_v14, 0.0 }
 0x24e   :  { %v465_v16 = vrot.slane %v462_v15, 4  ;;  %v472_v17 = vmul.f32 %v462_v15, %v462_v15 }
 0x250   :  { %v466_v18 = vadd.f32 %v465_v16, %v462_v15  ;;  %v473_v19 = vrot.slane %v472_v17, 4 }
 0x252   :  { %v467_v20 = vrot.slane %v466_v18, 2  ;;  %v474_v21 = vadd.f32 %v473_v19, %v472_v17 }
 0x254   :  { %v468_v22 = vadd.f32 %v467_v20, %v466_v18  ;;  %v475_v3 = vrot.slane %v474_v21, 2 }
 0x256   :  { %v476_v23 = vadd.f32 %v475_v3, %v474_v21  ;;  %v469_v24 = vrot.slane %v468_v22, 1 }
 0x258   :  { %v477_v25 = vrot.slane %v476_v23, 1  ;;  %v470_v26 = vadd.f32 %v469_v24, %v468_v22 }
 0x25a   :  { %v478_v27 = vadd.f32 %v477_v25, %v476_v23  ;;  %v471_v28 = vmul.f32 0.125, %v470_v26 }
 0x25c   :  { %v479_v29 = vmul.f32 0.125, %v478_v27  ;;  %v480_v30 = vmul.f32 %v471_v28, %v471_v28 }
 0x25e   :  { %v481_v31 = vsub.f32 %v479_v29, %v480_v30 }
 0x260   :  { %v482_v32 = vmax.f32 %v481_v31, 0.0 }
 0x262   :  { %v483_v33 = vadd.f32 1e-05, %v482_v32 }
 0x264   :  { %1084 = vrsqrt.f32 %v483_v33 }
 0x265   :  { %1086 = vpow2.f32 %v686_v43 }
 0x26e   :  { %v1085_v35 = vpop.eup %1084 }
 0x26f   :  { %v485_v36 = vmul.f32 %v1085_v35, %v463_v34  ;;  %v1087_v44 = vpop.eup %1086 }
 0x270   :  { %v669_v45 = vadd.f32 1.0, %v1087_v44 }
 0x271   :  { %v486_v38 = vmul.f32 %v485_v36, %v471_v28  ;;  %v507_v39 = vrot.slane %v485_v36, %v1279_v49 }
 0x272   :  { %1088 = vrcp.f32 %v669_v45 }
 0x273   :  { %v487_v40 = vsub.f32 %v464_v37, %v486_v38  ;;  %v508_v41 = vmul.f32 %v507_v39, %v462_v15 }
 0x275   :  { %914 = vmatmul.mubr.f32.vlgmr.msra.gmra.mrb[4].mxu0 %v487_v40  ;;  %949 = vmatmul.mubr.f32.vlgmr.msra.gmra.mrb[4].mxu1 %v508_v41 }
 0x27c   :  { %v1089_v46 = vpop.eup %1088 }
 0x27d   :  { %672 = vst [vmem:[%s1332_s4 + $0x8] sm:$0x1] %v1089_v46 }
 0x348   :  { %v575_v47 = vpop.f32.mrb[4].mxu0  ;;  %v649_v48 = vpop.f32.mrb[4].mxu1 }
 0x349   :  { %v582_v50 = vrot.slane %v575_v47, %v1279_v49  ;;  %v915_v51 = vpop.f32.mrb[5].mxu0  ;;  %v950_v52 = vpop.f32.mrb[5].mxu1 }
 0x34b   :  { %v650_v6 = vadd.f32 %v649_v48, %v582_v50 }
 0x34d   :  { %v655_v54 = vadd.f32 %v654_v53, %v650_v6 }
 0x34f   :  { %v684_v55 = vmul.f32 -1.442695, %v655_v54 }
 0x351   :  { %1090 = vpow2.f32 %v684_v55 }
 0x35b   :  { %v1091_v56 = vpop.eup %1090 }
 0x35c   :  { %v659_v57 = vadd.f32 1.0, %v1091_v56 }
 0x35e   :  { %1092 = vrcp.f32 %v659_v57 }
 0x368   :  { %v1093_v58 = vpop.eup %1092 }
 0x369   :  { %662 = vst [vmem:[%s1332_s4] sm:$0xff] %v1093_v58 }
 0x36a   :  { %677 = vsyncpa [#allocation3], 1 }
 0x36b   :  { %678 = vsyncpa [#allocation6], 1 }
 0x36c   :  { %679 = vsyncpa [#allocation4], 1 }

</bundles_post_ra>
